<compile_context>
chip_gen: v7x
topology: tpu7x:2x2x1
jax: 0.10.0
libtpu: 0.0.40
codegen_flags: <defaults>
</compile_context>

<pallas_src>
import numpy as np
import jax
import jax.numpy as jnp
from jax.experimental import pallas as pl
from jax.experimental.pallas import tpu as pltpu

A_CUBIC = -0.75  # PyTorch bicubic kernel parameter


def _cubic1(x):  # |x| <= 1
    return ((A_CUBIC + 2.0) * x - (A_CUBIC + 3.0)) * x * x + 1.0


def _cubic2(x):  # 1 < |x| < 2
    return ((A_CUBIC * x - 5.0 * A_CUBIC) * x + 8.0 * A_CUBIC) * x - 4.0 * A_CUBIC


def bicubic_upsample_matrix(in_size, scale):
    """U (in_size*scale, in_size) s.t. U @ v == 1-D PyTorch bicubic upsample
    (align_corners=False, border indices clamped, clamped weights accumulated)."""
    out_size = in_size * scale
    U = np.zeros((out_size, in_size), np.float32)
    inv_scale = 1.0 / scale
    for i in range(out_size):
        src = inv_scale * (i + 0.5) - 0.5           # area_pixel_compute_source_index
        idx = int(np.floor(src))
        t = src - idx
        w = (_cubic2(t + 1.0), _cubic1(t), _cubic1(1.0 - t), _cubic2(2.0 - t))
        for k in range(4):
            j = min(max(idx - 1 + k, 0), in_size - 1)
            U[i, j] += w[k]
    return U


# ----------------------------------------------------------------------------- phase A
def _conv_wup_kernel(x_ref, w2_ref, b_ref, uwt_ref, tmp_ref, bri_ref, df_s, d_s):
    """Per image: fused 1x1 convs (one MXU matmul), ReLU, bri write, W-direction bicubic."""
    H, W = d_s.shape
    x = x_ref[0]                                                   # (C, H*W), lane-dense

    # Both 1x1 convs in a single MXU matmul: row 0 = (w_out - w_bri)·x, row 1 = w_bri·x.
    df_s[...] = jnp.dot(w2_ref[...], x, preferred_element_type=jnp.float32)   # (2, H*W)
    bri_ref[0] = df_s[1:2, :] + b_ref[1]                           # lane-dense flat bri

    # Relayout the flat (1, H*W) density row into (H, W) for the separable upsample.
    if W % 128 == 0:
        # Lane-aligned: each target row is whole 128-lane groups -> single retile.
        d_hw = df_s[0:1, :].reshape(H, W)
    else:
        # W < 128 / unaligned: per-row copies (masked stores).  Runs once per image in
        # phase A, so it is off the steady-state H-upsample path.
        for hh in range(H):
            d_s[pl.ds(hh, 1), :] = df_s[0:1, pl.ds(hh * W, W)]
        d_hw = d_s[...]

    # relu(out - bri) with the subtraction already fused into row 0 of the weights.
    d_hw = jnp.maximum(d_hw + b_ref[0], 0.0).astype(uwt_ref.dtype)

    # W-direction bicubic upsample on the MXU: (H, W) @ (W, 8W) -> (H, 8W)
    tmp_ref[0] = jnp.dot(d_hw, uwt_ref[...],
                         preferred_element_type=jnp.float32).astype(tmp_ref.dtype)


# ----------------------------------------------------------------------------- phase B
def _hup_kernel(tmp_ref, uh_ref, up_ref):
    """H-direction bicubic upsample for one (n, Hout-tile) block. Uh stays resident."""
    h = pl.program_id(1)
    th = up_ref.shape[1]                                           # tile_hout (static)
    start = pl.multiple_of(h * th, 8)
    uh_tile = uh_ref[pl.ds(start, th), :]                          # (tile_hout, H)
    up_ref[0] = jnp.dot(uh_tile, tmp_ref[0],
                        preferred_element_type=jnp.float32).astype(up_ref.dtype)


# ----------------------------------------------------------------------------- wrapper
def _vmem_cap_bytes():
    try:
        cap = int(pltpu.get_tpu_info().vmem_capacity_bytes)
        if cap > 0:
            return cap
    except Exception:
        pass
    return 64 * 1024 * 1024          # conservative default (v7x per-TensorCore VMEM)


def _vmem_limit_bytes(need_bytes, cap_bytes):
    lim = max(2 * need_bytes, 32 * 1024 * 1024)
    lim = min(lim, cap_bytes - 8 * 1024 * 1024, 100 * 1024 * 1024)
    return int(max(lim, 16 * 1024 * 1024))


def density_gen(x_nchw, w_out, b_out, w_bri, b_bri, scale=8,
                tile_hout=None, upsample_bf16=True, up_dtype=jnp.float32):
    N, C, H, W = x_nchw.shape
    Hout, Wout = H * scale, W * scale
    HW = H * W

    # FREE reshape of the contiguous NCHW tensor (no transpose, no dtype copy).
    x_flat = jnp.reshape(x_nchw, (N, C, HW))
    x_bpe = jnp.dtype(x_flat.dtype).itemsize

    # Fuse the subtraction into the weights and stack BOTH convs into one (2, C) matrix.
    w_out = jnp.asarray(w_out).reshape(C)
    w_bri = jnp.asarray(w_bri).reshape(C)
    b_out = jnp.asarray(b_out, jnp.float32).reshape(())
    b_bri = jnp.asarray(b_bri, jnp.float32).reshape(())
    w2 = jnp.stack([w_out - w_bri, w_bri], axis=0).astype(x_flat.dtype)   # (2, C)
    b2 = jnp.stack([b_out - b_bri, b_bri]).astype(jnp.float32)            # (2,) -> SMEM

    # Upsample matrices; bf16 operands + f32 accumulation on the MXU by default.
    cdt = jnp.bfloat16 if upsample_bf16 else jnp.float32
    cbpe = jnp.dtype(cdt).itemsize
    uh = jnp.asarray(bicubic_upsample_matrix(H, scale), dtype=cdt)        # (Hout, H)
    uwt = jnp.asarray(bicubic_upsample_matrix(W, scale).T, dtype=cdt)     # (W, Wout)

    vmem_cap = _vmem_cap_bytes()
    up_bpe = jnp.dtype(up_dtype).itemsize

    # Hout tiling for phase B: VMEM-capacity-aware (bigger tiles on 128 MiB parts,
    # smaller on v7x's 64 MiB).  Hout = 8*H is always a multiple of 8, so tile 8 always
    # divides and the heuristic cannot dead-end.
    if tile_hout is None:
        out_block_budget = min(vmem_cap // 8, 16 * 1024 * 1024)
        max_rows = max(8, out_block_budget // max(1, 2 * Wout * up_bpe))
        tile_hout = 8
        for cand in (1024, 512, 256, 128, 64, 32, 16, 8):
            if cand <= max_rows and Hout % cand == 0:
                tile_hout = cand
                break
    assert Hout % tile_hout == 0 and tile_hout % 8 == 0, "tile_hout must divide Hout and be a multiple of 8"
    nh = Hout // tile_hout

    # ------------------------------------------------ phase A: convs + W-upsample
    need_a = (2 * (C * HW * x_bpe + 2 * C * x_bpe + W * Wout * cbpe
                   + H * Wout * cbpe + HW * 4)
              + 2 * HW * 4 + H * W * 4)                                   # scratch

    x_spec_kwargs = {}
    if 2 * C * HW * x_bpe > vmem_cap // 4:
        # Huge feature map: single-buffer x (dominant VMEM block; with grid=(N,) double
        # buffering only buys cross-image overlap).
        x_spec_kwargs["pipeline_mode"] = pl.Buffered(1)

    tmp, bri = pl.pallas_call(
        _conv_wup_kernel,
        out_shape=(jax.ShapeDtypeStruct((N, H, Wout), cdt),
                   jax.ShapeDtypeStruct((N, 1, HW), jnp.float32)),
        grid_spec=pltpu.PrefetchScalarGridSpec(
            num_scalar_prefetch=0,
            grid=(N,),
            in_specs=[
                pl.BlockSpec((1, C, HW), lambda n: (n, 0, 0), **x_spec_kwargs),
                pl.BlockSpec((2, C), lambda n: (0, 0)),                  # fused weights
                pl.BlockSpec(memory_space=pltpu.MemorySpace.SMEM),       # biases
                pl.BlockSpec((W, Wout), lambda n: (0, 0)),               # Uw^T
            ],
            out_specs=[
                pl.BlockSpec((1, H, Wout), lambda n: (n, 0, 0)),         # tmp = d @ Uw^T
                pl.BlockSpec((1, 1, HW), lambda n: (n, 0, 0)),           # flat bri
            ],
            scratch_shapes=[
                pltpu.VMEM((2, HW), jnp.float32),                        # fused conv result
                pltpu.VMEM((H, W), jnp.float32),                         # relayouted density
            ],
        ),
        compiler_params=pltpu.CompilerParams(
            dimension_semantics=("parallel",),
            vmem_limit_bytes=_vmem_limit_bytes(need_a, vmem_cap),
        ),
    )(x_flat, w2, b2, uwt)

    # ------------------------------------------------ phase B: H-upsample (both axes parallel)
    need_b = 2 * (H * Wout * cbpe + Hout * H * cbpe + tile_hout * Wout * up_bpe)

    up = pl.pallas_call(
        _hup_kernel,
        out_shape=jax.ShapeDtypeStruct((N, Hout, Wout), up_dtype),
        grid_spec=pltpu.PrefetchScalarGridSpec(
            num_scalar_prefetch=0,
            grid=(N, nh),
            in_specs=[
                pl.BlockSpec((1, H, Wout), lambda n, h: (n, 0, 0)),      # tmp, once per n
                pl.BlockSpec((Hout, H), lambda n, h: (0, 0)),            # resident Uh
            ],
            out_specs=pl.BlockSpec((1, tile_hout, Wout), lambda n, h: (n, h, 0)),
        ),
        compiler_params=pltpu.CompilerParams(
            dimension_semantics=("parallel", "parallel"),
            vmem_limit_bytes=_vmem_limit_bytes(need_b, vmem_cap),
        ),
    )(tmp, uh)

    # Match PyTorch output shapes: (N, 1, 8H, 8W) and (N, 1, H, W); reshapes are free.
    return up[:, None, :, :], jnp.reshape(bri, (N, 1, H, W))


def density_gen_reference(x_nchw, w_out, b_out, w_bri, b_bri, scale=8):
    """Pure-JAX reference with the PyTorch math (for validating the kernel plumbing)."""
    N, C, H, W = x_nchw.shape
    out = jnp.einsum('nchw,c->nhw', x_nchw, w_out) + b_out
    bri = jnp.einsum('nchw,c->nhw', x_nchw, w_bri) + b_bri
    d = jax.nn.relu(out - bri)
    Uh = jnp.asarray(bicubic_upsample_matrix(H, scale))
    Uw = jnp.asarray(bicubic_upsample_matrix(W, scale))
    up = jnp.einsum('ph,nhw,qw->npq', Uh, d, Uw)
    return up[:, None, :, :], bri[:, None, :, :]


if __name__ == "__main__":
    key = jax.random.PRNGKey(0)
    kx, kw1, kb1, kw2, kb2 = jax.random.split(key, 5)

    N, C, H, W = 2, 64, 16, 16        # C=64 is fixed by the module definition
    x = jax.random.normal(kx, (N, C, H, W), jnp.float32)

    # Conv2d(64, 1, kernel_size=1) -> weight (64,), bias ()
    w_out = jax.random.normal(kw1, (C,), jnp.float32) * 0.1
    b_out = jax.random.normal(kb1, (), jnp.float32) * 0.1
    w_bri = jax.random.normal(kw2, (C,), jnp.float32) * 0.1
    b_bri = jax.random.normal(kb2, (), jnp.float32) * 0.1

    up_exp, bri_exp = density_gen_reference(x, w_out, b_out, w_bri, b_bri)

    # Exact f32 path, multi-tile Hout (tile_hout=64 < Hout=128) -> tight tolerance.
    up, bri = density_gen(x, w_out, b_out, w_bri, b_bri,
                          tile_hout=64, upsample_bf16=False)
    jax.block_until_ready((up, bri))
    assert up.shape == (N, 1, H * 8, W * 8) and bri.shape == (N, 1, H, W)
    np.testing.assert_allclose(np.asarray(up), np.asarray(up_exp), rtol=2e-4, atol=2e-5)
    np.testing.assert_allclose(np.asarray(bri), np.asarray(bri_exp), rtol=2e-4, atol=2e-5)

    # Default fast path: bf16 operands / f32 accumulation on the upsample matmuls.
    up_f, bri_f = density_gen(x, w_out, b_out, w_bri, b_bri)
    jax.block_until_ready((up_f, bri_f))
    np.testing.assert_allclose(np.asarray(bri_f), np.asarray(bri_exp), rtol=2e-4, atol=2e-5)
    np.testing.assert_allclose(np.asarray(up_f), np.asarray(up_exp), rtol=5e-2, atol=1e-1)

    print("KERNEL_OK")
</pallas_src>

<mosaic_0001>
module attributes {stable_mosaic.version = 11 : i64} {
  func.func @_conv_wup_kernel(%arg0: i32, %arg1: memref<1x64x256xf32, #tpu.memory_space<vmem>>, %arg2: memref<2x64xf32, #tpu.memory_space<vmem>>, %arg3: memref<2xf32, #tpu.memory_space<smem>>, %arg4: memref<16x128xf32, #tpu.memory_space<vmem>>, %arg5: memref<1x16x128xf32, #tpu.memory_space<vmem>>, %arg6: memref<1x1x256xf32, #tpu.memory_space<vmem>>, %arg7: memref<2x256xf32, #tpu.memory_space<vmem>>, %arg8: memref<16x16xf32, #tpu.memory_space<vmem>>) attributes {dimension_semantics = [#tpu.dimension_semantics<parallel>], iteration_bounds = array<i64: 2>, scalar_prefetch = 0 : i64, scratch_operands = 2 : i64, tpu.core_type = #tpu.core_type<tc>, window_params = [{transform_indices = @transform_0, window_bounds = array<i64: 1, 64, 256>}, {pipeline_mode = #tpu.pipeline_mode<synchronous>, transform_indices = @transform_1, window_bounds = array<i64: 2, 64>}, {transform_indices = @transform_2, window_bounds = array<i64: 2>}, {pipeline_mode = #tpu.pipeline_mode<synchronous>, transform_indices = @transform_3, window_bounds = array<i64: 16, 128>}, {transform_indices = @transform_4, window_bounds = array<i64: 1, 16, 128>}, {transform_indices = @transform_5, window_bounds = array<i64: 1, 1, 256>}]} {
    %c0 = arith.constant 0 : index
    %c0_0 = arith.constant 0 : index
    %c0_1 = arith.constant 0 : index
    %0 = vector.load %arg1[%c0, %c0_0, %c0_1] : memref<1x64x256xf32, #tpu.memory_space<vmem>>, vector<1x64x256xf32>
    %1 = vector.shape_cast %0 : vector<1x64x256xf32> to vector<64x256xf32>
    %c0_2 = arith.constant 0 : index
    %c0_3 = arith.constant 0 : index
    %2 = vector.load %arg2[%c0_2, %c0_3] : memref<2x64xf32, #tpu.memory_space<vmem>>, vector<2x64xf32>
    %cst = arith.constant dense<0.000000e+00> : vector<2x256xf32>
    %3 = tpu.matmul %2, %1, %cst {dimension_numbers = #tpu.dot_dimension_numbers<[1], [0], [0], [1], [0, 0, 1, 1], [], []>} : vector<2x64xf32>, vector<64x256xf32>, vector<2x256xf32> -> vector<2x256xf32>
    %c0_4 = arith.constant 0 : index
    %c0_5 = arith.constant 0 : index
    %4 = vector.load %arg7[%c0_4, %c0_5] : memref<2x256xf32, #tpu.memory_space<vmem>>, vector<2x256xf32>
    tpu.vector_store %arg7[%c0_4, %c0_5], %3 {strides = array<i32>} : memref<2x256xf32, #tpu.memory_space<vmem>>, vector<2x256xf32>,
    %c1 = arith.constant 1 : index
    %c0_6 = arith.constant 0 : index
    %5 = vector.load %arg7[%c1, %c0_6] : memref<2x256xf32, #tpu.memory_space<vmem>>, vector<1x256xf32>
    %c1_7 = arith.constant 1 : index
    %6 = memref.load %arg3[%c1_7] : memref<2xf32, #tpu.memory_space<smem>>
    %7 = vector.broadcast %6 : f32 to vector<1x256xf32>
    %8 = arith.addf %5, %7 : vector<1x256xf32>
    %c0_8 = arith.constant 0 : index
    %c0_9 = arith.constant 0 : index
    %c0_10 = arith.constant 0 : index
    %9 = vector.load %arg6[%c0_8, %c0_9, %c0_10] : memref<1x1x256xf32, #tpu.memory_space<vmem>>, vector<1x1x256xf32>
    %10 = vector.shape_cast %9 : vector<1x1x256xf32> to vector<1x256xf32>
    %11 = vector.shape_cast %8 : vector<1x256xf32> to vector<1x1x256xf32>
    tpu.vector_store %arg6[%c0_8, %c0_9, %c0_10], %11 {strides = array<i32>} : memref<1x1x256xf32, #tpu.memory_space<vmem>>, vector<1x1x256xf32>,
    %c0_11 = arith.constant 0 : index
    %c0_12 = arith.constant 0 : index
    %12 = vector.load %arg7[%c0_11, %c0_12] : memref<2x256xf32, #tpu.memory_space<vmem>>, vector<1x16xf32>
    %c0_13 = arith.constant 0 : index
    %c0_14 = arith.constant 0 : index
    %13 = vector.load %arg8[%c0_13, %c0_14] : memref<16x16xf32, #tpu.memory_space<vmem>>, vector<1x16xf32>
    tpu.vector_store %arg8[%c0_13, %c0_14], %12 {strides = array<i32>} : memref<16x16xf32, #tpu.memory_space<vmem>>, vector<1x16xf32>,
    %c0_15 = arith.constant 0 : index
    %c16 = arith.constant 16 : index
    %14 = vector.load %arg7[%c0_15, %c16] : memref<2x256xf32, #tpu.memory_space<vmem>>, vector<1x16xf32>
    %c1_16 = arith.constant 1 : index
    %c0_17 = arith.constant 0 : index
    %15 = vector.load %arg8[%c1_16, %c0_17] : memref<16x16xf32, #tpu.memory_space<vmem>>, vector<1x16xf32>
    tpu.vector_store %arg8[%c1_16, %c0_17], %14 {strides = array<i32>} : memref<16x16xf32, #tpu.memory_space<vmem>>, vector<1x16xf32>,
    %c0_18 = arith.constant 0 : index
    %c32 = arith.constant 32 : index
    %16 = vector.load %arg7[%c0_18, %c32] : memref<2x256xf32, #tpu.memory_space<vmem>>, vector<1x16xf32>
    %c2 = arith.constant 2 : index
    %c0_19 = arith.constant 0 : index
    %17 = vector.load %arg8[%c2, %c0_19] : memref<16x16xf32, #tpu.memory_space<vmem>>, vector<1x16xf32>
    tpu.vector_store %arg8[%c2, %c0_19], %16 {strides = array<i32>} : memref<16x16xf32, #tpu.memory_space<vmem>>, vector<1x16xf32>,
    %c0_20 = arith.constant 0 : index
    %c48 = arith.constant 48 : index
    %18 = vector.load %arg7[%c0_20, %c48] : memref<2x256xf32, #tpu.memory_space<vmem>>, vector<1x16xf32>
    %c3 = arith.constant 3 : index
    %c0_21 = arith.constant 0 : index
    %19 = vector.load %arg8[%c3, %c0_21] : memref<16x16xf32, #tpu.memory_space<vmem>>, vector<1x16xf32>
    tpu.vector_store %arg8[%c3, %c0_21], %18 {strides = array<i32>} : memref<16x16xf32, #tpu.memory_space<vmem>>, vector<1x16xf32>,
    %c0_22 = arith.constant 0 : index
    %c64 = arith.constant 64 : index
    %20 = vector.load %arg7[%c0_22, %c64] : memref<2x256xf32, #tpu.memory_space<vmem>>, vector<1x16xf32>
    %c4 = arith.constant 4 : index
    %c0_23 = arith.constant 0 : index
    %21 = vector.load %arg8[%c4, %c0_23] : memref<16x16xf32, #tpu.memory_space<vmem>>, vector<1x16xf32>
    tpu.vector_store %arg8[%c4, %c0_23], %20 {strides = array<i32>} : memref<16x16xf32, #tpu.memory_space<vmem>>, vector<1x16xf32>,
    %c0_24 = arith.constant 0 : index
    %c80 = arith.constant 80 : index
    %22 = vector.load %arg7[%c0_24, %c80] : memref<2x256xf32, #tpu.memory_space<vmem>>, vector<1x16xf32>
    %c5 = arith.constant 5 : index
    %c0_25 = arith.constant 0 : index
    %23 = vector.load %arg8[%c5, %c0_25] : memref<16x16xf32, #tpu.memory_space<vmem>>, vector<1x16xf32>
    tpu.vector_store %arg8[%c5, %c0_25], %22 {strides = array<i32>} : memref<16x16xf32, #tpu.memory_space<vmem>>, vector<1x16xf32>,
    %c0_26 = arith.constant 0 : index
    %c96 = arith.constant 96 : index
    %24 = vector.load %arg7[%c0_26, %c96] : memref<2x256xf32, #tpu.memory_space<vmem>>, vector<1x16xf32>
    %c6 = arith.constant 6 : index
    %c0_27 = arith.constant 0 : index
    %25 = vector.load %arg8[%c6, %c0_27] : memref<16x16xf32, #tpu.memory_space<vmem>>, vector<1x16xf32>
    tpu.vector_store %arg8[%c6, %c0_27], %24 {strides = array<i32>} : memref<16x16xf32, #tpu.memory_space<vmem>>, vector<1x16xf32>,
    %c0_28 = arith.constant 0 : index
    %c112 = arith.constant 112 : index
    %26 = vector.load %arg7[%c0_28, %c112] : memref<2x256xf32, #tpu.memory_space<vmem>>, vector<1x16xf32>
    %c7 = arith.constant 7 : index
    %c0_29 = arith.constant 0 : index
    %27 = vector.load %arg8[%c7, %c0_29] : memref<16x16xf32, #tpu.memory_space<vmem>>, vector<1x16xf32>
    tpu.vector_store %arg8[%c7, %c0_29], %26 {strides = array<i32>} : memref<16x16xf32, #tpu.memory_space<vmem>>, vector<1x16xf32>,
    %c0_30 = arith.constant 0 : index
    %c128 = arith.constant 128 : index
    %28 = vector.load %arg7[%c0_30, %c128] : memref<2x256xf32, #tpu.memory_space<vmem>>, vector<1x16xf32>
    %c8 = arith.constant 8 : index
    %c0_31 = arith.constant 0 : index
    %29 = vector.load %arg8[%c8, %c0_31] : memref<16x16xf32, #tpu.memory_space<vmem>>, vector<1x16xf32>
    tpu.vector_store %arg8[%c8, %c0_31], %28 {strides = array<i32>} : memref<16x16xf32, #tpu.memory_space<vmem>>, vector<1x16xf32>,
    %c0_32 = arith.constant 0 : index
    %c144 = arith.constant 144 : index
    %30 = vector.load %arg7[%c0_32, %c144] : memref<2x256xf32, #tpu.memory_space<vmem>>, vector<1x16xf32>
    %c9 = arith.constant 9 : index
    %c0_33 = arith.constant 0 : index
    %31 = vector.load %arg8[%c9, %c0_33] : memref<16x16xf32, #tpu.memory_space<vmem>>, vector<1x16xf32>
    tpu.vector_store %arg8[%c9, %c0_33], %30 {strides = array<i32>} : memref<16x16xf32, #tpu.memory_space<vmem>>, vector<1x16xf32>,
    %c0_34 = arith.constant 0 : index
    %c160 = arith.constant 160 : index
    %32 = vector.load %arg7[%c0_34, %c160] : memref<2x256xf32, #tpu.memory_space<vmem>>, vector<1x16xf32>
    %c10 = arith.constant 10 : index
    %c0_35 = arith.constant 0 : index
    %33 = vector.load %arg8[%c10, %c0_35] : memref<16x16xf32, #tpu.memory_space<vmem>>, vector<1x16xf32>
    tpu.vector_store %arg8[%c10, %c0_35], %32 {strides = array<i32>} : memref<16x16xf32, #tpu.memory_space<vmem>>, vector<1x16xf32>,
    %c0_36 = arith.constant 0 : index
    %c176 = arith.constant 176 : index
    %34 = vector.load %arg7[%c0_36, %c176] : memref<2x256xf32, #tpu.memory_space<vmem>>, vector<1x16xf32>
    %c11 = arith.constant 11 : index
    %c0_37 = arith.constant 0 : index
    %35 = vector.load %arg8[%c11, %c0_37] : memref<16x16xf32, #tpu.memory_space<vmem>>, vector<1x16xf32>
    tpu.vector_store %arg8[%c11, %c0_37], %34 {strides = array<i32>} : memref<16x16xf32, #tpu.memory_space<vmem>>, vector<1x16xf32>,
    %c0_38 = arith.constant 0 : index
    %c192 = arith.constant 192 : index
    %36 = vector.load %arg7[%c0_38, %c192] : memref<2x256xf32, #tpu.memory_space<vmem>>, vector<1x16xf32>
    %c12 = arith.constant 12 : index
    %c0_39 = arith.constant 0 : index
    %37 = vector.load %arg8[%c12, %c0_39] : memref<16x16xf32, #tpu.memory_space<vmem>>, vector<1x16xf32>
    tpu.vector_store %arg8[%c12, %c0_39], %36 {strides = array<i32>} : memref<16x16xf32, #tpu.memory_space<vmem>>, vector<1x16xf32>,
    %c0_40 = arith.constant 0 : index
    %c208 = arith.constant 208 : index
    %38 = vector.load %arg7[%c0_40, %c208] : memref<2x256xf32, #tpu.memory_space<vmem>>, vector<1x16xf32>
    %c13 = arith.constant 13 : index
    %c0_41 = arith.constant 0 : index
    %39 = vector.load %arg8[%c13, %c0_41] : memref<16x16xf32, #tpu.memory_space<vmem>>, vector<1x16xf32>
    tpu.vector_store %arg8[%c13, %c0_41], %38 {strides = array<i32>} : memref<16x16xf32, #tpu.memory_space<vmem>>, vector<1x16xf32>,
    %c0_42 = arith.constant 0 : index
    %c224 = arith.constant 224 : index
    %40 = vector.load %arg7[%c0_42, %c224] : memref<2x256xf32, #tpu.memory_space<vmem>>, vector<1x16xf32>
    %c14 = arith.constant 14 : index
    %c0_43 = arith.constant 0 : index
    %41 = vector.load %arg8[%c14, %c0_43] : memref<16x16xf32, #tpu.memory_space<vmem>>, vector<1x16xf32>
    tpu.vector_store %arg8[%c14, %c0_43], %40 {strides = array<i32>} : memref<16x16xf32, #tpu.memory_space<vmem>>, vector<1x16xf32>,
    %c0_44 = arith.constant 0 : index
    %c240 = arith.constant 240 : index
    %42 = vector.load %arg7[%c0_44, %c240] : memref<2x256xf32, #tpu.memory_space<vmem>>, vector<1x16xf32>
    %c15 = arith.constant 15 : index
    %c0_45 = arith.constant 0 : index
    %43 = vector.load %arg8[%c15, %c0_45] : memref<16x16xf32, #tpu.memory_space<vmem>>, vector<1x16xf32>
    tpu.vector_store %arg8[%c15, %c0_45], %42 {strides = array<i32>} : memref<16x16xf32, #tpu.memory_space<vmem>>, vector<1x16xf32>,
    %c0_46 = arith.constant 0 : index
    %c0_47 = arith.constant 0 : index
    %44 = vector.load %arg8[%c0_46, %c0_47] : memref<16x16xf32, #tpu.memory_space<vmem>>, vector<16x16xf32>
    %c0_48 = arith.constant 0 : index
    %45 = memref.load %arg3[%c0_48] : memref<2xf32, #tpu.memory_space<smem>>
    %46 = vector.broadcast %45 : f32 to vector<16x16xf32>
    %47 = arith.addf %44, %46 : vector<16x16xf32>
    %cst_49 = arith.constant 0.000000e+00 : f32
    %48 = vector.broadcast %cst_49 : f32 to vector<16x16xf32>
    %49 = arith.maximumf %47, %48 : vector<16x16xf32>
    %c0_50 = arith.constant 0 : index
    %c0_51 = arith.constant 0 : index
    %50 = vector.load %arg4[%c0_50, %c0_51] : memref<16x128xf32, #tpu.memory_space<vmem>>, vector<16x128xf32>
    %cst_52 = arith.constant dense<0.000000e+00> : vector<16x128xf32>
    %51 = tpu.matmul %49, %50, %cst_52 {dimension_numbers = #tpu.dot_dimension_numbers<[1], [0], [0], [1], [0, 0, 1, 1], [], []>} : vector<16x16xf32>, vector<16x128xf32>, vector<16x128xf32> -> vector<16x128xf32>
    %c0_53 = arith.constant 0 : index
    %c0_54 = arith.constant 0 : index
    %c0_55 = arith.constant 0 : index
    %52 = vector.load %arg5[%c0_53, %c0_54, %c0_55] : memref<1x16x128xf32, #tpu.memory_space<vmem>>, vector<1x16x128xf32>
    %53 = vector.shape_cast %52 : vector<1x16x128xf32> to vector<16x128xf32>
    %54 = vector.shape_cast %51 : vector<16x128xf32> to vector<1x16x128xf32>
    tpu.vector_store %arg5[%c0_53, %c0_54, %c0_55], %54 {strides = array<i32>} : memref<1x16x128xf32, #tpu.memory_space<vmem>>, vector<1x16x128xf32>,
    return
  }
  func.func @transform_0(%arg0: i32) -> (i32, i32, i32) {
    %c0_i32 = arith.constant 0 : i32
    %c0_i32_0 = arith.constant 0 : i32
    %c0_i32_1 = arith.constant 0 : i32
    return %arg0, %c0_i32, %c0_i32_0 : i32, i32, i32
  }
  func.func @transform_1(%arg0: i32) -> (i32, i32) {
    %c0_i32 = arith.constant 0 : i32
    %c0_i32_0 = arith.constant 0 : i32
    %c0_i32_1 = arith.constant 0 : i32
    return %c0_i32, %c0_i32_0 : i32, i32
  }
  func.func @transform_2(%arg0: i32) -> i32 {
    %c0_i32 = arith.constant 0 : i32
    %c0_i32_0 = arith.constant 0 : i32
    return %c0_i32 : i32
  }
  func.func @transform_3(%arg0: i32) -> (i32, i32) {
    %c0_i32 = arith.constant 0 : i32
    %c0_i32_0 = arith.constant 0 : i32
    %c0_i32_1 = arith.constant 0 : i32
    return %c0_i32, %c0_i32_0 : i32, i32
  }
  func.func @transform_4(%arg0: i32) -> (i32, i32, i32) {
    %c0_i32 = arith.constant 0 : i32
    %c0_i32_0 = arith.constant 0 : i32
    %c0_i32_1 = arith.constant 0 : i32
    return %arg0, %c0_i32, %c0_i32_0 : i32, i32, i32
  }
  func.func @transform_5(%arg0: i32) -> (i32, i32, i32) {
    %c0_i32 = arith.constant 0 : i32
    %c0_i32_0 = arith.constant 0 : i32
    %c0_i32_1 = arith.constant 0 : i32
    return %arg0, %c0_i32, %c0_i32_0 : i32, i32, i32
  }
}

</mosaic_0001>

<bundles_post_ra>
// kernel: tpu_custom_call.1
= control target key start
LH: loop header
LB: loop body
LE: loop exit
PB: predicated region body
PF: predicated region fallthrough
CT: control target
= control target key end

     0   :  { %s1477_s0 = inlined_call_operand.hbm [shape: f32[2,64,256], index: 0, kind: input, shape index: {}]   ;;  %s1478_s1 = inlined_call_operand.vmem [shape: f32[2,64], index: 1, kind: input, shape index: {}]   ;;  %s1479_s2 = inlined_call_operand.vmem [shape: f32[2], index: 2, kind: input, shape index: {}]   ;;  %s1480_s3 = inlined_call_operand.hbm [shape: f32[16,128], index: 3, kind: input, shape index: {}]   ;;  %s1481_s4 = inlined_call_operand.hbm [shape: f32[2,16,128], index: 4, kind: output, shape index: {0}]   ;;  %s1482_s5 = inlined_call_operand.hbm [shape: f32[2,1,256], index: 5, kind: output, shape index: {1}]  }
   0x1   :  { %1486 = sst [smem:[#allocation20_spill]] %s1479_s2 }
   0x2   :  { %11 = vsyncpa [#allocation5], 0 }
   0x3   :  { %13 = vsyncpa [#allocation5 + $0x1], 0 }
   0x4   :  { %14 = vsyncpa [#allocation7], 0 }
   0x5   :  { %15 = vsyncpa [#allocation10], 0 }
   0x6   :  { %16 = vsyncpa [#allocation6], 0 }
   0x7   :  { %18 = vsyncpa [#allocation6 + $0x1], 0 }
   0x8   :  { %19 = vsyncpa [#allocation13], 0 }
   0x9   :  { %21 = vsyncpa [#allocation13 + $0x1], 0  ;;  %s1187_s18 = smov 0   ;;  %s1189_s19 = smov 0  }
   0xa   :  { %s1191_s20 = smov 0   ;;  %s1193_s21 = smov 0  }
   0xb LB: > { %s1208_s22 = sadd.s32 4294967295, %s1136_s21   ;;  %s796_s23 = sadd.s32 4294967294, %s1136_s21   ;;  %s1136_s21 = sphi %s1193_s21, %s1508_s21   ;;  %s1132_s20 = sphi %s1191_s20, %s1507_s20   ;;  %s1128_s19 = sphi %s1189_s19, %s1506_s19   ;;  %s1124_s18 = sphi %s1187_s18, %s1505_s18  }
   0xc   : > { %s1212_s24 = sadd.s32 1, %s1136_s21   ;;  %s34_s25 = sadd.s32 1, %s1132_s20 }
   0xd   : > { %s31_s26 = ssub.s32 %s1136_s21, %s1212_s24  ;;  %p41_p0 = scmp.ne.s32.totalorder %s1132_s20, %s1128_s19 }
   0xe   : > { %p32_p1 = scmp.eq.s32.totalorder %s31_s26, 0  ;;  %p42_p2 = scmp.eq.s32.totalorder %s1136_s21, 0 }
   0xf   : > { %p47_p3 = scmp.ne.s32.totalorder %s1128_s19, %s1124_s18  ;;  %p1483_p4 = scmp.eq.s32.totalorder %s1208_s22, 0 }
  0x10   : > { %s1224_s27 = scalar_select %p32_p1, %s1132_s20, %s34_s25  }
  0x11   : > { %p1226_p5 = por %p42_p2, %p41_p0  ;;  %p1232_p6 = por %p1483_p4, %p47_p3 }
  0x12   : > { %1487 = sst [smem:[#allocation19_spill]] %s1224_s27  ;;  %p134_p7 = scmp.eq.s32.totalorder %s1208_s22, 1 }
  0x13   : > { %s1489_s29 = scalar_select %p1232_p6, 1, 0 }
  0x14   : > { %p140_p8 = scmp.eq.s32.totalorder %s796_s23, 1  ;;  %p797_p9 = scmp.ge.s32.totalorder %s1136_s21, 1 }
  0x15   : > { %p173_p10 = scmp.lt.s32.totalorder %s1136_s21, 3  ;;  %p1239_p11 = por %p134_p7, %p41_p0 }
  0x16   : > { %p1243_p12 = por %p140_p8, %p47_p3  ;;  %s1493_s2 = sld [smem:[#allocation20_spill]] }
  0x17   : > { %s1490_s30 = scalar_select %p1239_p11, 1, 0 }
  0x18   : > { %s1491_s6 = scalar_select %p1243_p12, 1, 0 }
  0x19   : > { %p1247_p13 = pnand %p797_p9, %p173_p10  ;;  %p905_p2 = scmp.lt.s32.totalorder %s1136_s21, 2 }
  0x1a   : > { %s1138_s13 = smov [#allocation9]  }
  0x1b   : > { %p885_p1 = pneg %p1247_p13  ;;  %p1266_p3 = pnand %p905_p2, %p1226_p5 }
  0x1c   : > { %s189_s10 = sshll.u32 %s1493_s2, 4  ;;  %s199_s14 = sshll.u32 %s1138_s13, 4  ;;  %s190_s10 = int_to_ptr.vmem [resolvable:$true] %s189_s10  ;;  %s1270_s14 = int_to_ptr.vmem [resolvable:$true] %s199_s14 }
  0x1d   : > { %p1260_p7 = pnand %p885_p1, %p1483_p4  ;;  %s957_s15 = scalar_lea.vmem %s190_s10, 16 }
  0x1e   : > { %p958_p8 = scmp.ne.s32.totalorder %s190_s10, %s957_s15  ;;  %p965_p0 = scmp.lt.s32.totalorder %s190_s10, %s190_s10 }
  0x1f   : > { %p959_p9 = pneg %p1260_p7  ;;  %p966_p4 = scmp.lt.s32.totalorder %s957_s15, %s957_s15 }
  0x21   : > { %p960_p10 = pnand %p959_p9, %p958_p8  ;;  %p967_p12 = por %p966_p4, %p965_p0 }
  0x23   : > { %p961_p1 = pneg %p960_p10 }
  0x25   : > { %p968_p11 = pnand %p967_p12, %p961_p1 }
  0x27   : > { %971 = shalt.err (!%p968_p11)
}
  0x28   : > { %s1139_s16 = smov [#allocation8]   ;;  %s213_s17 = sand.u32 1, %s1132_s20  }
  0x29   : > { %888 = dma.vmem_to_smem (!%p1260_p7), %s190_s10, 16, %s1139_s16, [#allocation7]  }
  0x2a   : > { %s972_s26 = scalar_lea.hbm %s1480_s3, 256 }
  0x2b   : > { %p973_p5 = scmp.ne.s32.totalorder %s1480_s3, %s972_s26  ;;  %p979_p11 = scmp.lt.u32.totalorder %s972_s26, %s1480_s3 }
  0x2d   : > { %p975_p4 = pnand %p973_p5, %p959_p9 }
  0x2f   : > { %p976_p12 = pneg %p975_p4 }
  0x31   : > { %p981_p0 = pnand %p979_p11, %p976_p12 }
  0x33   : > { %984 = shalt.err (!%p981_p0)
}
  0x34   : > { %s985_s10 = scalar_lea.vmem %s1270_s14, 256  ;;  %p993_p1 = scmp.lt.s32.totalorder %s1270_s14, %s1270_s14 }
  0x35   : > { %p986_p2 = scmp.ne.s32.totalorder %s1270_s14, %s985_s10  ;;  %p994_p5 = scmp.lt.s32.totalorder %s985_s10, %s985_s10 }
  0x37   : > { %p988_p8 = pnand %p986_p2, %p959_p9  ;;  %p995_p4 = por %p994_p5, %p993_p1 }
  0x39   : > { %p989_p10 = pneg %p988_p8 }
  0x3b   : > { %p996_p6 = pnand %p995_p4, %p989_p10 }
  0x3d   : > { %999 = shalt.err (!%p996_p6)
}
  0x3e   : > { %s1140_s15 = smov 128   ;;  %s1141_s16 = smov 8  }
  0x3f   : > { %891 = dma.hbm_to_vmem [thread:$0]  (!%p1260_p7), %s1480_s3, 256, %s1270_s14, [#allocation10], %s1140_s15, %s1140_s15, %s1141_s16  }
  0x40   : > { %s801_s26 = sshll.u32 %s213_s17, 7  ;;  %s837_s28 = sshll.u32 %s1136_s21, 11 }
  0x41   : > { %s1309_s13 = scalar_lea.hbm %s1477_s0, %s837_s28  ;;  %s217_s10 = scalar_lea.vmem [#allocation4], %s801_s26 }
  0x42   : > { %s224_s2 = sshll.u32 %s217_s10, 4  ;;  %s1313_s11 = scalar_lea.sflag [#allocation5], %s213_s17  ;;  %s1311_s2 = int_to_ptr.vmem [resolvable:$true] %s224_s2 }
  0x43   : > { %s1000_s27 = scalar_lea.hbm %s1309_s13, 2048  ;;  %p1002_p7 = pneg %p1266_p3 }
  0x44   : > { %p1001_p6 = scmp.ne.s32.totalorder %s1309_s13, %s1000_s27  ;;  %s1005_s16 = scalar_lea.hbm %s1477_s0, 4096 }
  0x45   : > { %p1006_p11 = scmp.lt.u32.totalorder %s1309_s13, %s1477_s0  ;;  %p1007_p0 = scmp.lt.u32.totalorder %s1005_s16, %s1000_s27 }
  0x46   : > { %p1003_p9 = pnand %p1002_p7, %p1001_p6  ;;  %p1009_p8 = scmp.lt.u32.totalorder %s1000_s27, %s1309_s13 }
  0x47   : > { %p1008_p2 = por %p1007_p0, %p1006_p11 }
  0x48   : > { %p1004_p12 = pneg %p1003_p9 }
  0x49   : > { %p1010_p10 = por %p1009_p8, %p1008_p2 }
  0x4b   : > { %p1011_p1 = pnand %p1010_p10, %p1004_p12 }
  0x4d   : > { %1014 = shalt.err (!%p1011_p1)
}
  0x4e   : > { %s1015_s17 = scalar_lea.vmem %s1311_s2, 2048  ;;  %s1142_s26 = smov [#allocation4]  }
  0x4f   : > { %p1016_p5 = scmp.ne.s32.totalorder %s1311_s2, %s1015_s17  ;;  %s1020_s28 = sshll.u32 %s1142_s26, 4  ;;  %s1021_s28 = int_to_ptr.vmem [resolvable:$false] %s1020_s28 }
  0x50   : > { %s1022_s8 = scalar_lea.vmem %s1021_s28, 4096  ;;  %p1023_p9 = scmp.lt.s32.totalorder %s1311_s2, %s1021_s28 }
  0x51   : > { %p1018_p4 = pnand %p1016_p5, %p1002_p7  ;;  %p1024_p11 = scmp.lt.s32.totalorder %s1022_s8, %s1015_s17 }
  0x53   : > { %p1019_p6 = pneg %p1018_p4  ;;  %p1025_p0 = por %p1024_p11, %p1023_p9 }
  0x55   : > { %p1026_p2 = pnand %p1025_p0, %p1019_p6 }
  0x57   : > { %1029 = shalt.err (!%p1026_p2)
}
  0x58   : > { %s1143_s27 = smov 256   ;;  %s1144_s9 = smov 16  }
  0x59   : > { %895 = dma.hbm_to_vmem [thread:$0]  (!%p1266_p3), %s1309_s13, 2048, %s1311_s2, %s1313_s11, %s1143_s27, %s1143_s27, %s1144_s9  }
  0x5a   : > { %236 = sbr.rel (%p1247_p13) target bundleno = 729 (0x2d9), region = 36  ;;  %s1344_s10 = sand.u32 (!%p1247_p13), 1, %s1128_s19  }
  0x5b   : > { %s805_s14 = sshll.u32 (!%p1247_p13), %s1344_s10, 7  ;;  %s239_s15 = scalar_lea.sflag (!%p1247_p13), [#allocation5], %s1344_s10 }
  0x5c   : > { %s1348_s16 = scalar_lea.vmem (!%p1247_p13), [#allocation4], %s805_s14  ;;  %p1496_p7 = scmp.ne.s32.totalorder (!%p1247_p13), %s1489_s29, 0 }
  0x61   : > { %1103 = dma.done.wait (%p1496_p7), %s239_s15, 2048  }
  0x62   : > { %1105 = vsyncadd (%p1496_p7), %s239_s15, 4294965248  ;;  %p1497_p3 = scmp.eq.s32.totalorder %s1208_s22, 0 }
  0x64   : > { %1107 = dma.done.wait (%p1497_p3), [#allocation7], 16   ;;  %p1498_p13 = pmov %p1497_p3 }
  0x65   : > { %p1499_p12 = pmov %p1497_p3 }
  0x66   : > { %1109 = vsyncadd (%p1498_p13), [#allocation7], 4294967280 }
  0x67   : > { %1111 = dma.done.wait (%p1499_p12), [#allocation10], 256   ;;  %p1500_p8 = pmov %p1497_p3 }
  0x69   : > { %1113 = vsyncadd (%p1500_p8), [#allocation10], 4294967040 }
  0x6a   : > { %255 = sfence }
  0x6b   : > { %v284_v0 = vld [vmem:[%s1348_s16 + $0x8] sm:$0xff]  ;;  %v286_v1 = vld [vmem:[%s1348_s16 + $0x18] sm:$0xff]  ;;  %v283_v2 = vld [vmem:[%s1348_s16] sm:$0xff]  ;;  %v1145_v7 = vmov 0.0   ;;  %vm300_vm0 = vcmask 523264   ;;  %s812_s7 = sld [smem:[#allocation8 + $0x1]]  ;;  %v392_v29 = vlaneseq }
  0x6c   : > { %v851_v3 = vpack.c.bf16 %v286_v1, %v284_v0  ;;  %v285_v4 = vld [vmem:[%s1348_s16 + $0x10] sm:$0xff]  ;;  %v288_v5 = vld [vmem:[%s1348_s16 + $0x28] sm:$0xff]  ;;  %v290_v6 = vld [vmem:[%s1348_s16 + $0x38] sm:$0xff]  ;;  %368 = vmatprep.mubr.f32.mxu0 %v1145_v7  ;;  %vm398_vm1 = vcmask 122880   ;;  %s809_s12 = sshll.u32 %s1344_s10, 1  ;;  %s1146_s13 = smov 80  }
  0x6d   : > { %v853_v8 = vpack.c.bf16 %v285_v4, %v283_v2  ;;  %v855_v9 = vpack.c.bf16 %v290_v6, %v288_v5  ;;  %v287_v10 = vld [vmem:[%s1348_s16 + $0x20] sm:$0xff]  ;;  %v289_v11 = vld [vmem:[%s1348_s16 + $0x30] sm:$0xff]  ;;  %v292_v12 = vld [vmem:[%s1348_s16 + $0x48] sm:$0xff]  ;;  %s1147_s11 = smov 112   ;;  %vm394_vm2 = vcmp.lt.s32.totalorder %v392_v29, 256  ;;  %s1384_s23 = scalar_lea.vmem [#allocation12], %s809_s12 }
  0x6e   : > { %852 = vmatprep.subr.bf16.mxu0 %v851_v3  ;;  %v294_v13 = vld [vmem:[%s1348_s16 + $0x58] sm:$0xff]  ;;  %v857_v14 = vpack.c.bf16 %v289_v11, %v287_v10  ;;  %v291_v16 = vld [vmem:[%s1348_s16 + $0x40] sm:$0xff]  ;;  %v293_v17 = vld [vmem:[%s1348_s16 + $0x50] sm:$0xff]  ;;  %s1148_s25 = smov 64   ;;  %s1149_s17 = smov 96   ;;  %vm552_vm3 = vcmask 130048  }
  0x6f   : > { %854 = vmatpush1.bf16.msra.mxu0 %v853_v8  ;;  %v859_v15 = vpack.c.bf16 %v294_v13, %v292_v12  ;;  %v296_v18 = vld [vmem:[%s1348_s16 + $0x68] sm:$0xff]  ;;  %v298_v19 = vld [vmem:[%s1348_s16 + $0x78] sm:$0xff]  ;;  %v861_v20 = vpack.c.bf16 %v293_v17, %v291_v16  ;;  %v295_v22 = vld [vmem:[%s1348_s16 + $0x60] sm:$0xff]  ;;  %s1150_s26 = smov 32   ;;  %s1151_s28 = smov 48  }
  0x70   : > { %856 = vmatprep.subr.bf16.mxu0 %v855_v9  ;;  %v863_v21 = vpack.c.bf16 %v298_v19, %v296_v18  ;;  %v297_v23 = vld [vmem:[%s1348_s16 + $0x70] sm:$0xff]  ;;  %v299_v25 = vld [vmem:[%s1478_s1] sm:$0x3]  ;;  %s1152_s8 = smov 16   ;;  %v550_v37 = vld [vmem:[#allocation9] sm:$0xff]  ;;  %s544_s27 = sld [smem:[#allocation8]] }
  0x71   : > { %v865_v24 = vpack.c.bf16 %v297_v23, %v295_v22  ;;  %v390_v30 = vstv %s812_s7  ;;  %v551_v38 = vld [vmem:[#allocation9 + $0x8] sm:$0xff]  ;;  %s839_s9 = sshll.u32 %s1208_s22, 5  ;;  %s672_s2 = sshll.u32 %s1384_s23, 4  ;;  %s673_s2 = int_to_ptr.vmem [resolvable:$true] %s672_s2 }
  0x72   : > { %v867_v39 = vpack.c.bf16 %v551_v38, %v550_v37  ;;  %s1405_s16 = scalar_lea.hbm %s1482_s5, %s839_s9  ;;  %s642_s29 = scalar_lea.sflag [#allocation13], %s1344_s10 }
  0x73   : > { %858 = vmatpush1.bf16.msra.mxu0 %v857_v14  ;;  %s1030_s7 = scalar_lea.vmem %s673_s2, 32  ;;  %p1501_p1 = scmp.ne.s32.totalorder %s1490_s30, 0 }
  0x74   : > { %860 = vmatprep.subr.bf16.mxu0 %v859_v15  ;;  %868 = vmatprep.subr.bf16.mxu1 %v867_v39  ;;  %p1031_p10 = scmp.ne.s32.totalorder %s673_s2, %s1030_s7  ;;  %s1153_s12 = smov [#allocation12]  }
  0x75   : > { %870 = vmatpush3.bf16.msra.mxu1 %v867_v39 }
  0x76   : > { %v545_v50 = vstv %s544_s27  ;;  %p1032_p5 = pnand %p1031_p10, %p1501_p1 }
  0x77   : > { %862 = vmatpush1.bf16.msra.mxu0 %v861_v20 }
  0x78   : > { %864 = vmatprep.subr.bf16.mxu0 %v863_v21  ;;  %p1033_p4 = pneg %p1032_p5 }
  0x7b   : > { %866 = vmatpush1.bf16.msra.mxu0 %v865_v24 }
  0x7e   : > { %810 = vmatmul.mubr.msk.f32.vlgmr.msra.gmra.mrb[0].mxu0 %vm300_vm0, %v299_v25 }
 0x151   : > { %v370_v26 = vpop.f32.mrb[0].mxu0 }
 0x152   : > { %v372_v27 = vpop.f32.mrb[1].mxu0 }
 0x153   : > { %v377_v28 = vcombine.low %v370_v26, %v372_v27 }
 0x155   : > { %811 = vst.sshfl [vmem:[#allocation2] sm:$0x33 pattern:$0x76325410] %v377_v28 }
 0x15c   : > { %v397_v31 = vld [vmem:[#allocation2] sm:$0x1]  ;;  %v470_v32 = vld [vmem:[#allocation2 + $0x2] sm:$0x1] }
 0x15d   : > { %v815_v33 = vld [vmem:[#allocation2] ss:$0 sm:$0xff]  ;;  %399 = vst.msk [vmem:[#allocation3] sm:$0x1] %vm398_vm1, %v397_v31  ;;  %471 = vst.msk [vmem:[#allocation3 + $0x8] sm:$0x1] %vm398_vm1, %v470_v32 }
 0x15e   : > { %426 = vrot.lane.b32.xlu1 %v815_v33, %s1146_s13  ;;  %406 = vrot.lane.b32.xlu0 %v815_v33, %s1147_s11  ;;  %v388_v34 = vld [vmem:[#allocation2 + $0x1] ss:$2 sm:$0x3]  ;;  %v820_v36 = vld [vmem:[#allocation2 + $0x2] ss:$0 sm:$0xff] }
 0x15f   : > { %v391_v35 = vadd.f32 %v390_v30, %v388_v34 }
 0x161   : > { %396 = vst.msk [vmem:[%s1384_s23] sm:$0x3] %vm394_vm2, %v391_v35 }
 0x162   : > { %436 = vrot.lane.b32.xlu1 %v815_v33, %s1148_s25  ;;  %416 = vrot.lane.b32.xlu0 %v815_v33, %s1149_s17 }
 0x166   : > { %456 = vrot.lane.b32.xlu1 %v815_v33, %s1150_s26  ;;  %446 = vrot.lane.b32.xlu0 %v815_v33, %s1151_s28 }
 0x16a   : > { %478 = vrot.lane.b32.xlu1 %v820_v36, %s1147_s11  ;;  %466 = vrot.lane.b32.xlu0 %v815_v33, %s1152_s8 }
 0x16e   : > { %498 = vrot.lane.b32.xlu1 %v820_v36, %s1146_s13  ;;  %488 = vrot.lane.b32.xlu0 %v820_v36, %s1149_s17  ;;  %s1034_s13 = sshll.u32 %s1153_s12, 4  ;;  %s1035_s13 = int_to_ptr.vmem [resolvable:$false] %s1034_s13 }
 0x16f   : > { %s1036_s11 = scalar_lea.vmem %s1035_s13, 64  ;;  %p1037_p6 = scmp.lt.s32.totalorder %s673_s2, %s1035_s13 }
 0x170   : > { %p1038_p9 = scmp.lt.s32.totalorder %s1036_s11, %s1030_s7 }
 0x172   : > { %518 = vrot.lane.b32.xlu1 %v820_v36, %s1151_s28  ;;  %508 = vrot.lane.b32.xlu0 %v820_v36, %s1148_s25  ;;  %p1039_p11 = por %p1038_p9, %p1037_p6 }
 0x174   : > { %p1040_p0 = pnand %p1039_p11, %p1033_p4 }
 0x176   : > { %538 = vrot.lane.b32.xlu1 %v820_v36, %s1152_s8  ;;  %528 = vrot.lane.b32.xlu0 %v820_v36, %s1150_s26 }
 0x1d0   : > { %v427_v40 = vpop.permute.xlu1 %426  ;;  %v407_v41 = vpop.permute.xlu0 %406 }
 0x1d1   : > { %429 = vst.msk [vmem:[#allocation3 + $0x3] sm:$0x1] %vm398_vm1, %v427_v40  ;;  %409 = vst.msk [vmem:[#allocation3 + $0x1] sm:$0x1] %vm398_vm1, %v407_v41 }
 0x1d4   : > { %v437_v42 = vpop.permute.xlu1 %436  ;;  %v417_v43 = vpop.permute.xlu0 %416 }
 0x1d5   : > { %439 = vst.msk [vmem:[#allocation3 + $0x4] sm:$0x1] %vm398_vm1, %v437_v42  ;;  %419 = vst.msk [vmem:[#allocation3 + $0x2] sm:$0x1] %vm398_vm1, %v417_v43 }
 0x1d8   : > { %v457_v44 = vpop.permute.xlu1 %456  ;;  %v447_v45 = vpop.permute.xlu0 %446 }
 0x1d9   : > { %459 = vst.msk [vmem:[#allocation3 + $0x6] sm:$0x1] %vm398_vm1, %v457_v44  ;;  %449 = vst.msk [vmem:[#allocation3 + $0x5] sm:$0x1] %vm398_vm1, %v447_v45 }
 0x1dc   : > { %v479_v46 = vpop.permute.xlu1 %478  ;;  %v467_v47 = vpop.permute.xlu0 %466 }
 0x1dd   : > { %481 = vst.msk [vmem:[#allocation3 + $0x9] sm:$0x1] %vm398_vm1, %v479_v46  ;;  %469 = vst.msk [vmem:[#allocation3 + $0x7] sm:$0x1] %vm398_vm1, %v467_v47 }
 0x1e0   : > { %v499_v48 = vpop.permute.xlu1 %498  ;;  %v489_v49 = vpop.permute.xlu0 %488 }
 0x1e1   : > { %501 = vst.msk [vmem:[#allocation3 + $0xb] sm:$0x1] %vm398_vm1, %v499_v48  ;;  %491 = vst.msk [vmem:[#allocation3 + $0xa] sm:$0x1] %vm398_vm1, %v489_v49 }
 0x1e4   : > { %v519_v51 = vpop.permute.xlu1 %518  ;;  %v509_v52 = vpop.permute.xlu0 %508  ;;  %v542_v53 = vld [vmem:[#allocation3] sm:$0xff] }
 0x1e5   : > { %521 = vst.msk [vmem:[#allocation3 + $0xd] sm:$0x1] %vm398_vm1, %v519_v51  ;;  %511 = vst.msk [vmem:[#allocation3 + $0xc] sm:$0x1] %vm398_vm1, %v509_v52  ;;  %v546_v54 = vadd.f32 %v545_v50, %v542_v53 }
 0x1e7   : > { %v548_v55 = vmax.f32 %v546_v54, 0.0 }
 0x1e8   : > { %v539_v56 = vpop.permute.xlu1 %538  ;;  %v529_v57 = vpop.permute.xlu0 %528 }
 0x1e9   : > { %541 = vst.msk [vmem:[#allocation3 + $0xf] sm:$0x1] %vm398_vm1, %v539_v56  ;;  %531 = vst.msk [vmem:[#allocation3 + $0xe] sm:$0x1] %vm398_vm1, %v529_v57  ;;  %848 = vmatprep.mubr.msk.f32.mxu1 %vm552_vm3, %v548_v55 }
 0x1f0   : > { %v543_v58 = vld [vmem:[#allocation3 + $0x8] sm:$0xff] }
 0x1f1   : > { %v547_v59 = vadd.f32 %v545_v50, %v543_v58 }
 0x1f3   : > { %v549_v60 = vmax.f32 %v547_v59, 0.0 }
 0x1f5   : > { %849 = vmatmul.mubr.msk.f32.vlgmr.msra.gmra.mrb[0].mxu1 %vm552_vm3, %v549_v60 }
 0x1f6   : > { %1043 = shalt.err (!%p1040_p0)
}
 0x1f7   : > { %s1044_s23 = scalar_lea.hbm %s1405_s16, 32  ;;  %s1048_s26 = scalar_lea.hbm %s1482_s5, 64 }
 0x1f8   : > { %p1045_p2 = scmp.ne.s32.totalorder %s1405_s16, %s1044_s23  ;;  %p1049_p13 = scmp.lt.u32.totalorder %s1405_s16, %s1482_s5 }
 0x1f9   : > { %p1050_p12 = scmp.lt.u32.totalorder %s1048_s26, %s1044_s23  ;;  %p1052_p10 = scmp.lt.u32.totalorder %s1044_s23, %s1405_s16 }
 0x1fa   : > { %p1046_p7 = pnand %p1045_p2, %p1501_p1 }
 0x1fb   : > { %p1051_p8 = por %p1050_p12, %p1049_p13 }
 0x1fc   : > { %p1047_p3 = pneg %p1046_p7 }
 0x1fd   : > { %p1053_p5 = por %p1052_p10, %p1051_p8 }
 0x1ff   : > { %p1054_p4 = pnand %p1053_p5, %p1047_p3 }
 0x201   : > { %1057 = shalt.err (!%p1054_p4)
}
 0x202   : > { %882 = dma.vmem_to_hbm [thread:$0]  (%p1501_p1), %s673_s2, 32, %s1405_s16, %s642_s29  }
 0x203   : > { %s808_s27 = sshll.u32 %s1344_s10, 4  ;;  %s838_s15 = sshll.u32 %s1208_s22, 8 }
 0x204   : > { %s275_s9 = scalar_lea.vmem [#allocation11], %s808_s27  ;;  %s1433_s13 = scalar_lea.hbm %s1481_s4, %s838_s15 }
 0x205   : > { %s655_s14 = sshll.u32 %s275_s9, 4  ;;  %s637_s11 = scalar_lea.sflag [#allocation6], %s1344_s10  ;;  %s1428_s14 = int_to_ptr.vmem [resolvable:$true] %s655_s14 }
 0x206   : > { %s1058_s16 = scalar_lea.vmem %s1428_s14, 256  ;;  %s1154_s22 = smov [#allocation11]  }
 0x207   : > { %p1059_p6 = scmp.ne.s32.totalorder %s1428_s14, %s1058_s16  ;;  %s1062_s2 = sshll.u32 %s1154_s22, 4  ;;  %s1063_s2 = int_to_ptr.vmem [resolvable:$false] %s1062_s2 }
 0x208   : > { %s1064_s29 = scalar_lea.vmem %s1063_s2, 512  ;;  %p1065_p0 = scmp.lt.s32.totalorder %s1428_s14, %s1063_s2 }
 0x209   : > { %p1060_p9 = pnand %p1059_p6, %p1501_p1  ;;  %p1066_p2 = scmp.lt.s32.totalorder %s1064_s29, %s1058_s16 }
 0x20b   : > { %p1061_p11 = pneg %p1060_p9  ;;  %p1067_p7 = por %p1066_p2, %p1065_p0 }
 0x20d   : > { %p1068_p3 = pnand %p1067_p7, %p1061_p11 }
 0x2c8   : > { %v850_v61 = vpop.f32.mrb[0].mxu1 }
 0x2c9   : > { %635 = vst [vmem:[%s275_s9 + $0x8] sm:$0xff] %v850_v61  ;;  %v625_v62 = vpop.f32.mrb[1].mxu1 }
 0x2ca   : > { %634 = vst [vmem:[%s275_s9] sm:$0xff] %v625_v62 }
 0x2cb   : > { %1071 = shalt.err (!%p1068_p3)
}
 0x2cc   : > { %s1072_s23 = scalar_lea.hbm %s1433_s13, 256  ;;  %s1076_s26 = scalar_lea.hbm %s1481_s4, 512 }
 0x2cd   : > { %p1073_p13 = scmp.ne.s32.totalorder %s1433_s13, %s1072_s23  ;;  %p1077_p10 = scmp.lt.u32.totalorder %s1433_s13, %s1481_s4 }
 0x2ce   : > { %p1078_p5 = scmp.lt.u32.totalorder %s1076_s26, %s1072_s23  ;;  %p1080_p6 = scmp.lt.u32.totalorder %s1072_s23, %s1433_s13 }
 0x2cf   : > { %p1074_p12 = pnand %p1073_p13, %p1501_p1 }
 0x2d0   : > { %p1079_p4 = por %p1078_p5, %p1077_p10 }
 0x2d1   : > { %p1075_p8 = pneg %p1074_p12 }
 0x2d2   : > { %p1081_p9 = por %p1080_p6, %p1079_p4 }
 0x2d4   : > { %p1082_p11 = pnand %p1081_p9, %p1075_p8 }
 0x2d6   : > { %1085 = shalt.err (!%p1082_p11)
}
 0x2d7   : > { %s1155_s27 = smov 128   ;;  %s1156_s9 = smov 8  }
 0x2d8   : > { %881 = dma.vmem_to_hbm [thread:$0]  (%p1501_p1), %s1428_s14, 256, %s1433_s13, %s637_s11, %s1155_s27, %s1155_s27, %s1156_s9  }
 0x2d9 PF: > { %s684_s15 = sand.u32 1, %s1124_s18   ;;  %p1502_p0 = scmp.ne.s32.totalorder %s1491_s6, 0 }
 0x2da   : > { %p1503_p2 = scmp.ge.s32.totalorder %s1136_s21, 2  ;;  %s685_s7 = scalar_lea.sflag [#allocation6], %s684_s15 }
 0x2dc   : > { %p897_p7 = pnand %p1503_p2, %p1502_p0 }
 0x2de   : > { %1115 = dma.done.wait (!%p897_p7), %s685_s7, 256  }
 0x2df   : > { %1117 = vsyncadd (!%p897_p7), %s685_s7, 4294967040  ;;  %s694_s12 = scalar_lea.sflag [#allocation13], %s684_s15 }
 0x2e0   : > { %1119 = dma.done.wait (!%p897_p7), %s694_s12, 32  }
 0x2e1   : > { %1121 = vsyncadd (!%p897_p7), %s694_s12, 4294967264  ;;  %s1504_s30 = sld [smem:[#allocation19_spill]]  ;;  %p24_p1 = scmp.ge.s32.totalorder %s1212_s24, 4  }
 0x2e2   : > { %s1505_s18 = smov %s1128_s19  ;;  %s1506_s19 = smov %s1132_s20 }
 0x2e3   : > { %s1508_s21 = smov %s1212_s24  ;;  %26 = sbr.rel (!%p24_p1) target bundleno = 11 (0xb), region = 108 }
 0x2e7   : > { %s1507_s20 = smov %s1504_s30 }
 0x2ea   :  { %699 = vsyncpa [#allocation5], 1 }
 0x2eb   :  { %701 = vsyncpa [#allocation5 + $0x1], 1 }
 0x2ec   :  { %702 = vsyncpa [#allocation10], 1 }
 0x2ed   :  { %703 = vsyncpa [#allocation6], 1 }
 0x2ee   :  { %705 = vsyncpa [#allocation6 + $0x1], 1 }
 0x2ef   :  { %706 = vsyncpa [#allocation13], 1 }
 0x2f0   :  { %708 = vsyncpa [#allocation13 + $0x1], 1 }
 0x2f1   :  { %709 = vsyncpa [#allocation7], 1 }
 0x2f2   :  { %711 = vsyncpa [#allocation7 + $0x1], 1 }

</bundles_post_ra>
